<compile_context>
chip_gen: v5e
topology: v5e:2x2
jax: 0.10.0
libtpu: 0.0.40
codegen_flags: <defaults>
</compile_context>

<pallas_src>
import jax
import jax.numpy as jnp
from jax import lax
from jax.experimental import pallas as pl
from jax.experimental.pallas import tpu as pltpu


def _cdiv(a, b):
    return (a + b - 1) // b


def _round_up(a, b):
    return _cdiv(a, b) * b


# ----------------------------------------------------------------------------
# Glue: axis-angle -> rotation matrix (standard SPIN batch_rodrigues; the
# reference snippet calls but does not define it).
# ----------------------------------------------------------------------------
def quat_to_rotmat(quat):
    norm_quat = quat / jnp.linalg.norm(quat, axis=1, keepdims=True)
    w, x, y, z = norm_quat[:, 0], norm_quat[:, 1], norm_quat[:, 2], norm_quat[:, 3]
    n = quat.shape[0]
    w2, x2, y2, z2 = w * w, x * x, y * y, z * z
    wx, wy, wz = w * x, w * y, w * z
    xy, xz, yz = x * y, x * z, y * z
    rot = jnp.stack(
        [
            w2 + x2 - y2 - z2, 2 * xy - 2 * wz, 2 * wy + 2 * xz,
            2 * wz + 2 * xy, w2 - x2 + y2 - z2, 2 * yz - 2 * wx,
            2 * xz - 2 * wy, 2 * wx + 2 * yz, w2 - x2 - y2 + z2,
        ],
        axis=1,
    ).reshape(n, 3, 3)
    return rot


def batch_rodrigues(theta):
    # theta: (N, 3) axis-angle
    angle = jnp.linalg.norm(theta + 1e-8, axis=1, keepdims=True)
    normalized = theta / angle
    half = angle * 0.5
    quat = jnp.concatenate([jnp.cos(half), jnp.sin(half) * normalized], axis=1)
    return quat_to_rotmat(quat)


# ----------------------------------------------------------------------------
# Pallas kernel.
# ----------------------------------------------------------------------------
# Sublane-row assignment inside the packed (8, 128) per-batch-tile output.
_ROW_POSE, _ROW_BETAS, _ROW_KP2D, _ROW_KP3D, _ROW_SHAPE, _ROW_CAM = 0, 1, 2, 3, 4, 5
_MAX_BATCH_TILE = 32
# Budget for the vertex double-buffers (2 inputs x 2 buffers); keeps comfortable
# headroom on every generation (v5e 16 MiB default scoped, v7x 64 MiB physical).
_VERTEX_BUF_BUDGET = 24 << 20


def _make_hmr_kernel(sec_off, n_batch, vc_total, b_tile, v_chunk):
    """Builds the kernel; `sec_off` maps section name -> (start, stop) lanes
    (all 128-aligned) inside the small slabs."""
    mask_rows = (n_batch % b_tile) != 0
    mask_lanes = (vc_total % v_chunk) != 0
    pose_lo = sec_off['pose'][0]       # lane 0 of the pose-weight section
                                       # carries has_smpl for each sample.

    def kernel(ps_ref, gs_ref, ws_ref, pv_ref, gv_ref, o_ref):
        i = pl.program_id(0)
        j = pl.program_id(1)

        row8 = lax.broadcasted_iota(jnp.int32, (8, 128), 0)

        def place(row, val):                      # val: (1, 1) f32
            return jnp.where(row8 == row, val, 0.0)

        # ---- small per-sample losses: compute once per batch tile ----------
        @pl.when(j == 0)
        def _():
            p = ps_ref[...]
            g = gs_ref[...]
            w = ws_ref[...]
            d = p - g
            sq = w * d * d                        # (b_tile, SMALL_W)

            def ssum(x):                          # (b_tile, k*128) -> (1, 1)
                r = jnp.sum(x, axis=1, keepdims=True)
                return jnp.sum(r, axis=0, keepdims=True)

            def sec(x, name):
                lo, hi = sec_off[name]
                return x[:, lo:hi]

            # camera loss:  (exp(-10*cam_x))^2 == exp(-20*cam_x); weight slab
            # selects lane 0 only.
            cam = sec(w, 'cam') * jnp.exp(-20.0 * sec(p, 'cam'))

            o_ref[...] = (
                place(_ROW_POSE, ssum(sec(sq, 'pose')))
                + place(_ROW_BETAS, ssum(sec(sq, 'betas')))
                + place(_ROW_KP2D, ssum(sec(sq, 'kp2d')))
                + place(_ROW_KP3D, ssum(sec(sq, 'kp3d')))
                + place(_ROW_CAM, ssum(cam))
            )

        # ---- per-vertex L1, accumulated across lane chunks ------------------
        dv = jnp.abs(pv_ref[...].astype(jnp.float32)
                     - gv_ref[...].astype(jnp.float32))

        def accumulate(dvv):
            row_l1 = jnp.sum(dvv, axis=1, keepdims=True)          # (b_tile, 1)
            has_smpl = ws_ref[:, pose_lo:pose_lo + 1]              # (b_tile, 1)
            s_shape = jnp.sum(has_smpl * row_l1, axis=0, keepdims=True)  # (1,1)
            o_ref[...] += place(_ROW_SHAPE, s_shape)

        if mask_rows or mask_lanes:               # trace-time decision
            # Runtime-gate the (expensive) iota/compare/select masking so only
            # the ragged edge blocks pay for it; interior blocks stay DMA-bound.
            conds = []
            if mask_lanes:
                conds.append(j == pl.num_programs(1) - 1)
            if mask_rows:
                conds.append(i == pl.num_programs(0) - 1)
            is_edge = conds[0] if len(conds) == 1 else (conds[0] | conds[1])

            @pl.when(is_edge)
            def _():
                valid = None
                if mask_lanes:
                    lane = lax.broadcasted_iota(jnp.int32, dv.shape, 1)
                    valid = (j * v_chunk + lane) < vc_total
                if mask_rows:
                    row = lax.broadcasted_iota(jnp.int32, dv.shape, 0)
                    rv = (i * b_tile + row) < n_batch
                    valid = rv if valid is None else (valid & rv)
                # zeroing dv (not just weighting) protects against stale
                # VMEM contents in the OOB tail of edge blocks.
                accumulate(jnp.where(valid, dv, 0.0))

            @pl.when(jnp.logical_not(is_edge))
            def _():
                accumulate(dv)
        else:
            accumulate(dv)

    return kernel


def _hmr_partial_sums(p_small, g_small, w_small, pv, gv, *,
                      n_batch, vc_total, sec_off, b_tile, v_chunk):
    nbt = _cdiv(n_batch, b_tile)
    n_chunks = _cdiv(vc_total, v_chunk)
    small_w = p_small.shape[1]
    b_pad = p_small.shape[0]
    v_item = jnp.dtype(pv.dtype).itemsize

    kernel = _make_hmr_kernel(sec_off, n_batch, vc_total, b_tile, v_chunk)
    small_spec = pl.BlockSpec((b_tile, small_w), lambda i, j: (i, 0))
    vert_spec = pl.BlockSpec((b_tile, v_chunk), lambda i, j: (i, j))

    # Explicit scoped-VMEM limit: v5e defaults to 16 MiB which can silently
    # constrain the double-buffers; keep under v7x's 64 MiB physical VMEM.
    vert_buf = 2 * 2 * b_tile * v_chunk * v_item
    small_buf = 3 * 2 * b_tile * small_w * 4
    out_buf = 2 * 8 * 128 * 4
    need = vert_buf + small_buf + out_buf
    vmem_limit = int(min(max(int(need * 1.5) + (4 << 20), 20 << 20), 48 << 20))

    # Advisory cost estimate so XLA overlaps this HBM-bound call correctly
    # with the surrounding packing / batch_rodrigues work.
    cost = pl.CostEstimate(
        flops=int(3 * n_batch * vc_total + 4 * b_pad * small_w),
        transcendentals=int(b_pad * 128),
        bytes_accessed=int(2 * n_batch * vc_total * v_item
                           + 3 * b_pad * small_w * 4
                           + nbt * 8 * 128 * 4),
    )

    out = pl.pallas_call(
        kernel,
        out_shape=jax.ShapeDtypeStruct((nbt * 8, 128), jnp.float32),
        grid_spec=pltpu.PrefetchScalarGridSpec(
            num_scalar_prefetch=0,
            grid=(nbt, n_chunks),
            in_specs=[small_spec, small_spec, small_spec, vert_spec, vert_spec],
            out_specs=pl.BlockSpec((8, 128), lambda i, j: (i, 0)),
        ),
        compiler_params=pltpu.CompilerParams(
            dimension_semantics=("parallel", "arbitrary"),
            vmem_limit_bytes=vmem_limit),
        cost_estimate=cost,
    )(p_small, g_small, w_small, pv, gv)

    # Each loss value is broadcast across the 128 lanes of its sublane row;
    # take lane 0 and sum the per-batch-tile partials.
    return jnp.sum(out.reshape(nbt, 8, 128)[:, :, 0], axis=0)     # (8,)


def _pick_batch_tile(B):
    """Batch tile: at least 2 tiles on v7x (2 TCs) so the 'parallel' axis can
    be sharded across both cores; single tile otherwise (v5e/v6e, 1 TC)."""
    two_core = False
    try:
        two_core = "v7" in jax.devices()[0].device_kind.lower()
    except Exception:
        pass
    if two_core and B >= 16:
        return min(_MAX_BATCH_TILE, _round_up(_cdiv(B, 2), 8))
    return B if B <= _MAX_BATCH_TILE else _MAX_BATCH_TILE


def _pick_vertex_chunk(VC, b_tile, itemsize):
    """Largest lane chunk (128-multiple, or the full row) whose 2x2 vertex
    double-buffers stay under _VERTEX_BUF_BUDGET."""
    per_lane = 2 * 2 * b_tile * itemsize
    max_lanes = max(128, _VERTEX_BUF_BUDGET // per_lane)
    if VC <= max_lanes:
        return VC                       # whole row in one block (no lane mask)
    return (max_lanes // 128) * 128


# ----------------------------------------------------------------------------
# HMRLoss forward (wrapper).
# ----------------------------------------------------------------------------
def hmr_loss_forward(
    pred,
    gt,
    shape_loss_weight=0.0,
    keypoint_loss_weight=5.0,
    pose_loss_weight=1.0,
    smpl_part_loss_weight=1.0,
    beta_loss_weight=0.001,
    openpose_train_weight=0.0,
    gt_train_weight=1.0,
    loss_weight=60.0,
    vertex_transport_dtype=None,   # only set if the producer already emits it
):
    f32 = jnp.float32
    pred_cam = pred['pred_cam'].astype(f32)
    pred_betas = pred['pred_shape'].astype(f32)
    pred_rotmat = pred['pred_pose'].astype(f32)
    pred_joints = pred['smpl_joints3d'].astype(f32)
    pred_vertices = pred['smpl_vertices']
    pred_kp2d = pred['smpl_joints2d'].astype(f32)

    gt_pose = gt['pose'].astype(f32)
    gt_betas = gt['betas'].astype(f32)
    gt_joints = gt['pose_3d'].astype(f32)
    gt_vertices = gt['vertices']
    gt_kp2d = gt['keypoints'].astype(f32)
    has_smpl = gt['has_smpl'].astype(f32)
    has_pose_3d = gt['has_pose_3d'].astype(f32)

    B = pred_rotmat.shape[0]
    J2d = gt_kp2d.shape[1]
    Jg3 = gt_joints.shape[1]
    V = pred_vertices.shape[1]
    n_beta = pred_betas.shape[1]

    msmpl = has_smpl.reshape(B, 1)
    mp3d = has_pose_3d.reshape(B, 1)

    # ---- pack small per-sample terms into 128-aligned lane sections --------
    pr = pred_rotmat.reshape(B, -1)                                  # (B, 216)
    gr = batch_rodrigues(gt_pose.reshape(-1, 3)).reshape(B, -1)      # (B, 216)

    p2 = pred_kp2d.reshape(B, J2d * 2)
    g2 = gt_kp2d[:, :, :2].reshape(B, J2d * 2)
    conf2 = gt_kp2d[:, :, 2:3]
    jw = jnp.concatenate(
        [jnp.full((1, 25, 1), openpose_train_weight, f32),
         jnp.full((1, J2d - 25, 1), gt_train_weight, f32)], axis=1)
    w2 = jnp.broadcast_to(conf2 * jw, (B, J2d, 2)).reshape(B, J2d * 2)

    # pelvis-centering hoisted out of the kernel (tiny arrays)
    p3 = pred_joints[:, 25:, :]                                      # (B, Jg3, 3)
    g3 = gt_joints[:, :, :3]
    conf3 = gt_joints[:, :, 3:4]
    g3c = g3 - 0.5 * (g3[:, 2:3, :] + g3[:, 3:4, :])
    p3c = p3 - 0.5 * (p3[:, 2:3, :] + p3[:, 3:4, :])
    w3 = jnp.broadcast_to(mp3d[:, :, None] * conf3, (B, Jg3, 3)).reshape(B, Jg3 * 3)

    cam_x = pred_cam[:, 0:1]

    # NOTE: the 'pose' section must stay first -- the kernel reads lane 0 of
    # its weight section (== has_smpl) as the per-sample mask of the vertex L1.
    sections = [
        ('pose', pr, gr, jnp.broadcast_to(msmpl, pr.shape)),
        ('betas', pred_betas, gt_betas, jnp.broadcast_to(msmpl, pred_betas.shape)),
        ('kp2d', p2, g2, w2),
        ('kp3d', p3c.reshape(B, Jg3 * 3), g3c.reshape(B, Jg3 * 3), w3),
        ('cam', cam_x, jnp.zeros_like(cam_x), jnp.ones_like(cam_x)),
    ]
    sec_off, p_parts, g_parts, w_parts, off = {}, [], [], [], 0
    for name, pa, ga, wa in sections:
        width = _round_up(pa.shape[1], 128)
        sec_off[name] = (off, off + width)
        off += width
        pad = ((0, 0), (0, width - pa.shape[1]))
        p_parts.append(jnp.pad(pa.astype(f32), pad))
        g_parts.append(jnp.pad(ga.astype(f32), pad))
        w_parts.append(jnp.pad(wa.astype(f32), pad))
    p_small = jnp.concatenate(p_parts, axis=1)
    g_small = jnp.concatenate(g_parts, axis=1)
    w_small = jnp.concatenate(w_parts, axis=1)

    # ---- batch tiling (rows of small slabs padded cheaply; big vertex arrays
    #      are never padded, edge blocks are masked inside the kernel) --------
    b_tile = _pick_batch_tile(B)
    nbt = _cdiv(B, b_tile)
    b_pad = nbt * b_tile
    if b_pad != B:
        rpad = ((0, b_pad - B), (0, 0))
        p_small = jnp.pad(p_small, rpad)
        g_small = jnp.pad(g_small, rpad)
        w_small = jnp.pad(w_small, rpad)

    # ---- lane-dense flattened vertices (free reshape, no HBM copy) ----------
    # Vertices travel in their native dtype: the kernel upcasts to f32.
    # TODO(synk): feed producer-emitted bf16 vertices to halve HBM traffic; a
    # wrapper-side .astype of a materialized f32 array would add an HBM pass.
    VC = V * 3
    pv = pred_vertices.reshape(B, VC)
    gv = gt_vertices.reshape(B, VC)
    if vertex_transport_dtype is not None and pv.dtype != vertex_transport_dtype:
        pv = pv.astype(vertex_transport_dtype)
        gv = gv.astype(vertex_transport_dtype)

    v_chunk = _pick_vertex_chunk(VC, b_tile, jnp.dtype(pv.dtype).itemsize)

    sums = _hmr_partial_sums(
        p_small, g_small, w_small, pv, gv,
        n_batch=B, vc_total=VC, sec_off=sec_off,
        b_tile=b_tile, v_chunk=v_chunk)
    s_pose = sums[_ROW_POSE]
    s_betas = sums[_ROW_BETAS]
    s_kp2d = sums[_ROW_KP2D]
    s_kp3d = sums[_ROW_KP3D]
    s_shape = sums[_ROW_SHAPE]
    s_cam = sums[_ROW_CAM]

    # ---- tiny normalisation / weighting glue (matches reference means) ------
    n_smpl = jnp.sum(msmpl)
    n_p3d = jnp.sum(mp3d)
    den_smpl = jnp.maximum(n_smpl, 1.0)
    den_p3d = jnp.maximum(n_p3d, 1.0)
    zero = jnp.float32(0.0)

    loss_regr_pose = jnp.where(n_smpl > 0, s_pose / (den_smpl * pr.shape[1]), zero)
    loss_regr_betas = jnp.where(n_smpl > 0, s_betas / (den_smpl * n_beta), zero)
    loss_keypoints = s_kp2d / (B * J2d * 2)
    loss_keypoints_3d = jnp.where(n_p3d > 0, s_kp3d / (den_p3d * Jg3 * 3), zero)
    loss_shape = jnp.where(n_smpl > 0, s_shape / (den_smpl * V * 3), zero)
    loss_cam = s_cam / B

    loss_shape = loss_shape * shape_loss_weight
    loss_keypoints = loss_keypoints * keypoint_loss_weight
    loss_keypoints_3d = loss_keypoints_3d * keypoint_loss_weight
    loss_regr_pose = loss_regr_pose * pose_loss_weight
    loss_regr_betas = loss_regr_betas * beta_loss_weight

    loss_dict = {
        'loss/loss_keypoints': loss_keypoints,
        'loss/loss_keypoints_3d': loss_keypoints_3d,
        'loss/loss_regr_pose': loss_regr_pose,
        'loss/loss_regr_betas': loss_regr_betas,
        'loss/loss_shape': loss_shape,
        'loss/loss_cam': loss_cam,
    }

    if 'pred_segm_rgb' in pred:
        # TODO(synk): optional part-segmentation branch kept in plain JAX
        # (not exercised by the synthetic test inputs).
        diff = pred['pred_segm_rgb'].astype(f32) - gt['gt_segm_rgb'].astype(f32)
        loss_dict['loss/loss_part_segm'] = jnp.mean(diff * diff) * smpl_part_loss_weight

    total = sum(loss_dict.values()) * loss_weight
    loss_dict['loss/total_loss'] = total
    return total, loss_dict


# ----------------------------------------------------------------------------
# Demo / smoke test.
# ----------------------------------------------------------------------------
if __name__ == "__main__":
    key = jax.random.PRNGKey(0)
    ks = jax.random.split(key, 12)

    B, V = 2, 432   # small synthetic sizes (SPIN uses V=6890)
    pred = {
        'pred_cam': jax.random.normal(ks[0], (B, 3), jnp.float32) * 0.1,
        'pred_shape': jax.random.normal(ks[1], (B, 10), jnp.float32),
        'pred_pose': jax.random.normal(ks[2], (B, 24, 3, 3), jnp.float32),
        'smpl_joints3d': jax.random.normal(ks[3], (B, 49, 3), jnp.float32),
        'smpl_vertices': jax.random.normal(ks[4], (B, V, 3), jnp.float32),
        'smpl_joints2d': jax.random.normal(ks[5], (B, 49, 2), jnp.float32),
    }
    gt = {
        'pose': jax.random.normal(ks[6], (B, 72), jnp.float32) * 0.5,
        'betas': jax.random.normal(ks[7], (B, 10), jnp.float32),
        'pose_3d': jnp.concatenate(
            [jax.random.normal(ks[8], (B, 24, 3), jnp.float32),
             jnp.ones((B, 24, 1), jnp.float32)], axis=-1),
        'vertices': jax.random.normal(ks[9], (B, V, 3), jnp.float32),
        'keypoints': jnp.concatenate(
            [jax.random.normal(ks[10], (B, 49, 2), jnp.float32),
             jnp.ones((B, 49, 1), jnp.float32)], axis=-1),
        'has_smpl': jnp.array([1.0, 1.0], jnp.float32),
        'has_pose_3d': jnp.array([1.0, 0.0], jnp.float32),
    }

    total, loss_dict = hmr_loss_forward(pred, gt)
    jax.block_until_ready(total)
    assert bool(jnp.isfinite(total)), "total loss is not finite"
    print("KERNEL_OK")
</pallas_src>

<mosaic_0001>
module attributes {stable_mosaic.version = 11 : i64} {
  func.func @kernel(%arg0: i32, %arg1: i32, %arg2: memref<2x768xf32, #tpu.memory_space<vmem>>, %arg3: memref<2x768xf32, #tpu.memory_space<vmem>>, %arg4: memref<2x768xf32, #tpu.memory_space<vmem>>, %arg5: memref<2x1296xf32, #tpu.memory_space<vmem>>, %arg6: memref<2x1296xf32, #tpu.memory_space<vmem>>, %arg7: memref<8x128xf32, #tpu.memory_space<vmem>>) attributes {dimension_semantics = [#tpu.dimension_semantics<parallel>, #tpu.dimension_semantics<arbitrary>], iteration_bounds = array<i64: 1, 1>, scalar_prefetch = 0 : i64, scratch_operands = 0 : i64, tpu.core_type = #tpu.core_type<tc>, window_params = [{transform_indices = @transform_0, window_bounds = array<i64: 2, 768>}, {transform_indices = @transform_1, window_bounds = array<i64: 2, 768>}, {transform_indices = @transform_2, window_bounds = array<i64: 2, 768>}, {transform_indices = @transform_3, window_bounds = array<i64: 2, 1296>}, {transform_indices = @transform_4, window_bounds = array<i64: 2, 1296>}, {transform_indices = @transform_5, window_bounds = array<i64: 8, 128>}]} {
    %0 = tpu.iota {dimensions = array<i32: 0>} : vector<8x128xi32>
    %c0_i32 = arith.constant 0 : i32
    %1 = arith.cmpi eq, %arg1, %c0_i32 : i32
    %2 = arith.extui %1 : i1 to i32
    %c0_i32_0 = arith.constant 0 : i32
    %3 = arith.cmpi ne, %2, %c0_i32_0 : i32
    scf.if %3 {
      %c0_12 = arith.constant 0 : index
      %c0_13 = arith.constant 0 : index
      %23 = vector.load %arg2[%c0_12, %c0_13] : memref<2x768xf32, #tpu.memory_space<vmem>>, vector<2x768xf32>
      %c0_14 = arith.constant 0 : index
      %c0_15 = arith.constant 0 : index
      %24 = vector.load %arg3[%c0_14, %c0_15] : memref<2x768xf32, #tpu.memory_space<vmem>>, vector<2x768xf32>
      %c0_16 = arith.constant 0 : index
      %c0_17 = arith.constant 0 : index
      %25 = vector.load %arg4[%c0_16, %c0_17] : memref<2x768xf32, #tpu.memory_space<vmem>>, vector<2x768xf32>
      %26 = arith.subf %23, %24 : vector<2x768xf32>
      %27 = arith.mulf %25, %26 : vector<2x768xf32>
      %28 = arith.mulf %27, %26 : vector<2x768xf32>
      %29 = vector.extract_strided_slice %25 {offsets = [0, 640], sizes = [2, 128], strides = [1, 1]} : vector<2x768xf32> to vector<2x128xf32>
      %30 = vector.extract_strided_slice %23 {offsets = [0, 640], sizes = [2, 128], strides = [1, 1]} : vector<2x768xf32> to vector<2x128xf32>
      %cst_18 = arith.constant -2.000000e+01 : f32
      %31 = vector.broadcast %cst_18 : f32 to vector<2x128xf32>
      %32 = arith.mulf %31, %30 : vector<2x128xf32>
      %33 = math.exp %32 : vector<2x128xf32>
      %34 = arith.mulf %29, %33 : vector<2x128xf32>
      %35 = vector.extract_strided_slice %28 {offsets = [0, 0], sizes = [2, 256], strides = [1, 1]} : vector<2x768xf32> to vector<2x256xf32>
      %cst_19 = arith.constant dense<0.000000e+00> : vector<2xf32>
      %36 = vector.multi_reduction <add>, %35, %cst_19 [1] : vector<2x256xf32> to vector<2xf32>
      %37 = vector.shape_cast %36 : vector<2xf32> to vector<2x1xf32>
      %cst_20 = arith.constant dense<0.000000e+00> : vector<1xf32>
      %38 = vector.multi_reduction <add>, %37, %cst_20 [0] : vector<2x1xf32> to vector<1xf32>
      %39 = vector.shape_cast %38 : vector<1xf32> to vector<1x1xf32>
      %c0_i32_21 = arith.constant 0 : i32
      %40 = vector.broadcast %c0_i32_21 : i32 to vector<8x128xi32>
      %41 = arith.cmpi eq, %0, %40 : vector<8x128xi32>
      %cst_22 = arith.constant 0.000000e+00 : f32
      %42 = vector.shape_cast %39 : vector<1x1xf32> to vector<1x1xf32>
      %43 = vector.broadcast %42 : vector<1x1xf32> to vector<8x128xf32>
      %44 = vector.broadcast %cst_22 : f32 to vector<8x128xf32>
      %45 = arith.select %41, %43, %44 : vector<8x128xi1>, vector<8x128xf32>
      %46 = vector.extract_strided_slice %28 {offsets = [0, 256], sizes = [2, 128], strides = [1, 1]} : vector<2x768xf32> to vector<2x128xf32>
      %cst_23 = arith.constant dense<0.000000e+00> : vector<2xf32>
      %47 = vector.multi_reduction <add>, %46, %cst_23 [1] : vector<2x128xf32> to vector<2xf32>
      %48 = vector.shape_cast %47 : vector<2xf32> to vector<2x1xf32>
      %cst_24 = arith.constant dense<0.000000e+00> : vector<1xf32>
      %49 = vector.multi_reduction <add>, %48, %cst_24 [0] : vector<2x1xf32> to vector<1xf32>
      %50 = vector.shape_cast %49 : vector<1xf32> to vector<1x1xf32>
      %c1_i32 = arith.constant 1 : i32
      %51 = vector.broadcast %c1_i32 : i32 to vector<8x128xi32>
      %52 = arith.cmpi eq, %0, %51 : vector<8x128xi32>
      %cst_25 = arith.constant 0.000000e+00 : f32
      %53 = vector.shape_cast %50 : vector<1x1xf32> to vector<1x1xf32>
      %54 = vector.broadcast %53 : vector<1x1xf32> to vector<8x128xf32>
      %55 = vector.broadcast %cst_25 : f32 to vector<8x128xf32>
      %56 = arith.select %52, %54, %55 : vector<8x128xi1>, vector<8x128xf32>
      %57 = arith.addf %45, %56 : vector<8x128xf32>
      %58 = vector.extract_strided_slice %28 {offsets = [0, 384], sizes = [2, 128], strides = [1, 1]} : vector<2x768xf32> to vector<2x128xf32>
      %cst_26 = arith.constant dense<0.000000e+00> : vector<2xf32>
      %59 = vector.multi_reduction <add>, %58, %cst_26 [1] : vector<2x128xf32> to vector<2xf32>
      %60 = vector.shape_cast %59 : vector<2xf32> to vector<2x1xf32>
      %cst_27 = arith.constant dense<0.000000e+00> : vector<1xf32>
      %61 = vector.multi_reduction <add>, %60, %cst_27 [0] : vector<2x1xf32> to vector<1xf32>
      %62 = vector.shape_cast %61 : vector<1xf32> to vector<1x1xf32>
      %c2_i32 = arith.constant 2 : i32
      %63 = vector.broadcast %c2_i32 : i32 to vector<8x128xi32>
      %64 = arith.cmpi eq, %0, %63 : vector<8x128xi32>
      %cst_28 = arith.constant 0.000000e+00 : f32
      %65 = vector.shape_cast %62 : vector<1x1xf32> to vector<1x1xf32>
      %66 = vector.broadcast %65 : vector<1x1xf32> to vector<8x128xf32>
      %67 = vector.broadcast %cst_28 : f32 to vector<8x128xf32>
      %68 = arith.select %64, %66, %67 : vector<8x128xi1>, vector<8x128xf32>
      %69 = arith.addf %57, %68 : vector<8x128xf32>
      %70 = vector.extract_strided_slice %28 {offsets = [0, 512], sizes = [2, 128], strides = [1, 1]} : vector<2x768xf32> to vector<2x128xf32>
      %cst_29 = arith.constant dense<0.000000e+00> : vector<2xf32>
      %71 = vector.multi_reduction <add>, %70, %cst_29 [1] : vector<2x128xf32> to vector<2xf32>
      %72 = vector.shape_cast %71 : vector<2xf32> to vector<2x1xf32>
      %cst_30 = arith.constant dense<0.000000e+00> : vector<1xf32>
      %73 = vector.multi_reduction <add>, %72, %cst_30 [0] : vector<2x1xf32> to vector<1xf32>
      %74 = vector.shape_cast %73 : vector<1xf32> to vector<1x1xf32>
      %c3_i32 = arith.constant 3 : i32
      %75 = vector.broadcast %c3_i32 : i32 to vector<8x128xi32>
      %76 = arith.cmpi eq, %0, %75 : vector<8x128xi32>
      %cst_31 = arith.constant 0.000000e+00 : f32
      %77 = vector.shape_cast %74 : vector<1x1xf32> to vector<1x1xf32>
      %78 = vector.broadcast %77 : vector<1x1xf32> to vector<8x128xf32>
      %79 = vector.broadcast %cst_31 : f32 to vector<8x128xf32>
      %80 = arith.select %76, %78, %79 : vector<8x128xi1>, vector<8x128xf32>
      %81 = arith.addf %69, %80 : vector<8x128xf32>
      %cst_32 = arith.constant dense<0.000000e+00> : vector<2xf32>
      %82 = vector.multi_reduction <add>, %34, %cst_32 [1] : vector<2x128xf32> to vector<2xf32>
      %83 = vector.shape_cast %82 : vector<2xf32> to vector<2x1xf32>
      %cst_33 = arith.constant dense<0.000000e+00> : vector<1xf32>
      %84 = vector.multi_reduction <add>, %83, %cst_33 [0] : vector<2x1xf32> to vector<1xf32>
      %85 = vector.shape_cast %84 : vector<1xf32> to vector<1x1xf32>
      %c5_i32 = arith.constant 5 : i32
      %86 = vector.broadcast %c5_i32 : i32 to vector<8x128xi32>
      %87 = arith.cmpi eq, %0, %86 : vector<8x128xi32>
      %cst_34 = arith.constant 0.000000e+00 : f32
      %88 = vector.shape_cast %85 : vector<1x1xf32> to vector<1x1xf32>
      %89 = vector.broadcast %88 : vector<1x1xf32> to vector<8x128xf32>
      %90 = vector.broadcast %cst_34 : f32 to vector<8x128xf32>
      %91 = arith.select %87, %89, %90 : vector<8x128xi1>, vector<8x128xf32>
      %92 = arith.addf %81, %91 : vector<8x128xf32>
      %c0_35 = arith.constant 0 : index
      %c0_36 = arith.constant 0 : index
      %93 = vector.load %arg7[%c0_35, %c0_36] : memref<8x128xf32, #tpu.memory_space<vmem>>, vector<8x128xf32>
      tpu.vector_store %arg7[%c0_35, %c0_36], %92 {strides = array<i32>} : memref<8x128xf32, #tpu.memory_space<vmem>>, vector<8x128xf32>,
    } else {
    }
    %c0 = arith.constant 0 : index
    %c0_1 = arith.constant 0 : index
    %4 = vector.load %arg5[%c0, %c0_1] : memref<2x1296xf32, #tpu.memory_space<vmem>>, vector<2x1296xf32>
    %c0_2 = arith.constant 0 : index
    %c0_3 = arith.constant 0 : index
    %5 = vector.load %arg6[%c0_2, %c0_3] : memref<2x1296xf32, #tpu.memory_space<vmem>>, vector<2x1296xf32>
    %6 = arith.subf %4, %5 : vector<2x1296xf32>
    %7 = math.absf %6 : vector<2x1296xf32>
    %cst = arith.constant dense<0.000000e+00> : vector<2xf32>
    %8 = vector.multi_reduction <add>, %7, %cst [1] : vector<2x1296xf32> to vector<2xf32>
    %9 = vector.shape_cast %8 : vector<2xf32> to vector<2x1xf32>
    %c0_4 = arith.constant 0 : index
    %c0_5 = arith.constant 0 : index
    %10 = vector.load %arg4[%c0_4, %c0_5] : memref<2x768xf32, #tpu.memory_space<vmem>>, vector<2x1xf32>
    %11 = arith.mulf %10, %9 : vector<2x1xf32>
    %cst_6 = arith.constant dense<0.000000e+00> : vector<1xf32>
    %12 = vector.multi_reduction <add>, %11, %cst_6 [0] : vector<2x1xf32> to vector<1xf32>
    %13 = vector.shape_cast %12 : vector<1xf32> to vector<1x1xf32>
    %c0_7 = arith.constant 0 : index
    %c0_8 = arith.constant 0 : index
    %14 = vector.load %arg7[%c0_7, %c0_8] : memref<8x128xf32, #tpu.memory_space<vmem>>, vector<8x128xf32>
    %c4_i32 = arith.constant 4 : i32
    %15 = vector.broadcast %c4_i32 : i32 to vector<8x128xi32>
    %16 = arith.cmpi eq, %0, %15 : vector<8x128xi32>
    %cst_9 = arith.constant 0.000000e+00 : f32
    %17 = vector.shape_cast %13 : vector<1x1xf32> to vector<1x1xf32>
    %18 = vector.broadcast %17 : vector<1x1xf32> to vector<8x128xf32>
    %19 = vector.broadcast %cst_9 : f32 to vector<8x128xf32>
    %20 = arith.select %16, %18, %19 : vector<8x128xi1>, vector<8x128xf32>
    %21 = arith.addf %14, %20 : vector<8x128xf32>
    %c0_10 = arith.constant 0 : index
    %c0_11 = arith.constant 0 : index
    %22 = vector.load %arg7[%c0_10, %c0_11] : memref<8x128xf32, #tpu.memory_space<vmem>>, vector<8x128xf32>
    tpu.vector_store %arg7[%c0_10, %c0_11], %21 {strides = array<i32>} : memref<8x128xf32, #tpu.memory_space<vmem>>, vector<8x128xf32>,
    return
  }
  func.func @transform_0(%arg0: i32, %arg1: i32) -> (i32, i32) {
    %c0_i32 = arith.constant 0 : i32
    %c0_i32_0 = arith.constant 0 : i32
    return %arg0, %c0_i32 : i32, i32
  }
  func.func @transform_1(%arg0: i32, %arg1: i32) -> (i32, i32) {
    %c0_i32 = arith.constant 0 : i32
    %c0_i32_0 = arith.constant 0 : i32
    return %arg0, %c0_i32 : i32, i32
  }
  func.func @transform_2(%arg0: i32, %arg1: i32) -> (i32, i32) {
    %c0_i32 = arith.constant 0 : i32
    %c0_i32_0 = arith.constant 0 : i32
    return %arg0, %c0_i32 : i32, i32
  }
  func.func @transform_3(%arg0: i32, %arg1: i32) -> (i32, i32) {
    %c0_i32 = arith.constant 0 : i32
    return %arg0, %arg1 : i32, i32
  }
  func.func @transform_4(%arg0: i32, %arg1: i32) -> (i32, i32) {
    %c0_i32 = arith.constant 0 : i32
    return %arg0, %arg1 : i32, i32
  }
  func.func @transform_5(%arg0: i32, %arg1: i32) -> (i32, i32) {
    %c0_i32 = arith.constant 0 : i32
    %c0_i32_0 = arith.constant 0 : i32
    return %arg0, %c0_i32 : i32, i32
  }
}

</mosaic_0001>

<bundles_post_ra>
// kernel: tpu_custom_call.1
= control target key start
LH: loop header
LB: loop body
LE: loop exit
PB: predicated region body
PF: predicated region fallthrough
CT: control target
= control target key end

     0   :  { %10 = vsyncpa [#allocation3], 0  ;;  %s546_s0 = inlined_call_operand.hbm [shape: f32[2,768], index: 0, kind: input, shape index: {}]   ;;  %s547_s1 = inlined_call_operand.hbm [shape: f32[2,768], index: 1, kind: input, shape index: {}]   ;;  %s548_s2 = inlined_call_operand.hbm [shape: f32[2,768], index: 2, kind: input, shape index: {}]   ;;  %s549_s3 = inlined_call_operand.hbm [shape: f32[2,1296], index: 3, kind: input, shape index: {}]   ;;  %s550_s4 = inlined_call_operand.hbm [shape: f32[2,1296], index: 4, kind: input, shape index: {}]   ;;  %s551_s5 = inlined_call_operand.hbm [shape: f32[8,128], index: 5, kind: output, shape index: {}]  }
   0x1   :  { %11 = vsyncpa [#allocation6], 0 }
   0x2   :  { %12 = vsyncpa [#allocation9], 0  ;;  %s30_s20 = sshll.u32 %s547_s1, 4  ;;  %s31_s20 = int_to_ptr.hbm [resolvable:$true] %s30_s20 }
   0x3   :  { %13 = vsyncpa [#allocation4], 0  ;;  %s464_s21 = smov [#allocation5]   ;;  %s52_s25 = sshll.u32 %s549_s3, 4  ;;  %s53_s25 = int_to_ptr.hbm [resolvable:$true] %s52_s25 }
   0x4   :  { %s32_s22 = sshll.u32 %s464_s21, 4  ;;  %s465_s26 = smov [#allocation8]   ;;  %s33_s22 = int_to_ptr.vmem [resolvable:$true] %s32_s22 }
   0x5   :  { %35 = dma.hbm_to_vmem [thread:$0]  %s31_s20, 192, %s33_s22, [#allocation6]  }
   0x6   :  { %s54_s27 = sshll.u32 %s465_s26, 4  ;;  %s19_s30 = sshll.u32 %s546_s0, 4  ;;  %s55_s27 = int_to_ptr.vmem [resolvable:$true] %s54_s27  ;;  %s20_s30 = int_to_ptr.hbm [resolvable:$true] %s19_s30 }
   0x7   :  { %57 = dma.hbm_to_vmem [thread:$0]  %s53_s25, 352, %s55_s27, [#allocation9]  }
   0x8   :  { %s41_s7 = sshll.u32 %s548_s2, 4  ;;  %s466_s8 = smov [#allocation2]   ;;  %s42_s7 = int_to_ptr.hbm [resolvable:$true] %s41_s7 }
   0x9   :  { %s21_s9 = sshll.u32 %s466_s8, 4  ;;  %s467_s3 = smov [#allocation7]   ;;  %s22_s9 = int_to_ptr.vmem [resolvable:$true] %s21_s9 }
   0xa   :  { %24 = dma.hbm_to_vmem [thread:$0]  %s20_s30, 192, %s22_s9, [#allocation3]  }
   0xb   :  { %s43_s10 = sshll.u32 %s467_s3, 4  ;;  %s63_s13 = sshll.u32 %s550_s4, 4  ;;  %s44_s10 = int_to_ptr.vmem [resolvable:$true] %s43_s10  ;;  %s64_s13 = int_to_ptr.hbm [resolvable:$true] %s63_s13 }
   0xc   :  { %46 = dma.hbm_to_vmem [thread:$0]  %s42_s7, 192, %s44_s10, [#allocation6]  }
   0xd   :  { %s468_s0 = smov [#allocation10]  }
   0xe   :  { %s65_s14 = sshll.u32 %s468_s0, 4  ;;  %s66_s14 = int_to_ptr.vmem [resolvable:$true] %s65_s14 }
   0xf   :  { %68 = dma.hbm_to_vmem [thread:$0]  %s64_s13, 352, %s66_s14, [#allocation9]  }
  0x10   :  { %456 = dma.done.wait [#allocation3], 192  }
  0x11   :  { %457 = vsyncadd [#allocation3], 4294967104 }
  0x12   :  { %458 = dma.done.wait [#allocation6], 384  }
  0x13   :  { %459 = vsyncadd [#allocation6], 4294966912 }
  0x14   :  { %460 = dma.done.wait [#allocation9], 704  }
  0x15   :  { %461 = vsyncadd [#allocation9], 4294966592  ;;  %v95_v0 = vld [vmem:[#allocation2] sm:$0xff]  ;;  %v97_v1 = vld [vmem:[#allocation5] sm:$0xff]  ;;  %vm123_vm0 = vcmask 1041408   ;;  %vm258_vm1 = vcmask 123904  }
  0x16   :  { %v99_v2 = vld [vmem:[#allocation7] sm:$0xff]  ;;  %v101_v3 = vsub.f32 %v95_v0, %v97_v1  ;;  %v198_v4 = vld [vmem:[#allocation8 + $0x8] sm:$0xff]  ;;  %v201_v5 = vld [vmem:[#allocation10 + $0x8] sm:$0xff]  ;;  %vm265_vm2 = vcmask 1024   ;;  %s470_s2 = smov [#allocation11]   ;;  %s290_s17 = sshll.u32 %s551_s5, 4  ;;  %s291_s17 = int_to_ptr.hbm [resolvable:$true] %s290_s17 }
  0x17   :  { %v204_v7 = vsub.f32 %v198_v4, %v201_v5  ;;  %v197_v12 = vld [vmem:[#allocation8] sm:$0xff]  ;;  %v200_v13 = vld [vmem:[#allocation10] sm:$0xff]  ;;  %v199_v17 = vld [vmem:[#allocation8 + $0x10] sm:$0x3f]  ;;  %s288_s4 = sshll.u32 %s470_s2, 4  ;;  %s289_s4 = int_to_ptr.vmem [resolvable:$true] %s288_s4 }
  0x18   :  { %v103_v6 = vmul.f32 %v101_v3, %v99_v2  ;;  %v203_v15 = vsub.f32 %v197_v12, %v200_v13  ;;  %v202_v18 = vld [vmem:[#allocation10 + $0x10] sm:$0x3f]  ;;  %v98_v21 = vld [vmem:[#allocation5 + $0x8] sm:$0xf]  ;;  %v100_v23 = vld [vmem:[#allocation7 + $0x8] sm:$0xf] }
  0x19   :  { %v207_v9 = vand.u32 2147483647, %v204_v7  ;;  %v96_v20 = vld [vmem:[#allocation2 + $0x8] sm:$0xf]  ;;  %v205_v26 = vsub.f32 %v199_v17, %v202_v18  ;;  %v114_v34 = vrot.slane %v100_v23, 2 }
  0x1a   :  { %v105_v8 = vmul.f32 %v103_v6, %v101_v3  ;;  %v206_v16 = vand.u32 2147483647, %v203_v15  ;;  %v102_v24 = vsub.f32 %v96_v20, %v98_v21  ;;  %v108_v25 = vrot.slane %v96_v20, 2  ;;  %v263_v12 = vld [vmem:[#allocation7] sm:$0x3] }
  0x1b   :  { %214 = vst [vmem:[#allocation1 + $0x20] ss:$4 sm:$0xff] %v207_v9  ;;  %v208_v31 = vand.u32 2147483647, %v205_v26  ;;  %v469_v9 = vmov 0  }
  0x1c   :  { %118 = vst [vmem:[#allocation1] ss:$4 sm:$0xff] %v105_v8  ;;  %v104_v27 = vmul.f32 %v102_v24, %v100_v23  ;;  %v110_v28 = vmul.f32 -20.0, %v108_v25  ;;  %309 = vset.pattern.permute.xlu0 %v469_v9 }
  0x1e   :  { %v106_v29 = vmul.f32 %v104_v27, %v102_v24  ;;  %v111_v30 = vmul.f32 1.442695, %v110_v28 }
  0x20   :  { %310 = vpow2.f32 %v111_v30  ;;  %v170_v32 = vsel %vm123_vm0, %v106_v29, 0.0 }
  0x21   :  { %171 = vadd.xlane.f32.xlu2 %v170_v32 }
  0x22   :  { %v219_v42 = vld.sshfl [vmem:[#allocation1 + $0x20] sm:$0xff pattern:$0x73625140]  ;;  %v220_v46 = vld.sshfl [vmem:[#allocation1 + $0x28] sm:$0xff pattern:$0x73625140] }
  0x23   :  { %v516_v10 = vld.sshfl [vmem:[#allocation1] sm:$0xff pattern:$0x73625140]  ;;  %v518_v11 = vld.sshfl [vmem:[#allocation1 + $0x8] sm:$0xff pattern:$0x73625140] }
  0x24   :  { %138 = vst [vmem:[#allocation1] ss:$4 sm:$0xff] %v105_v8  ;;  %v246_v49 = vsel %vm123_vm0, %v219_v42, 0.0  ;;  %v221_v50 = vld.sshfl [vmem:[#allocation1 + $0x30] sm:$0xff pattern:$0x73625140] }
  0x25   :  { %v248_v53 = vsel %vm123_vm0, %v220_v46, 0.0  ;;  %v222_v54 = vld.sshfl [vmem:[#allocation1 + $0x38] sm:$0xff pattern:$0x73625140]  ;;  %v250_v56 = vsel %vm123_vm0, %v221_v50, 0.0  ;;  %v124_v6 = vsel %vm123_vm0, %v516_v10, 0.0 }
  0x26   :  { %v311_v44 = vpop.eup %310  ;;  %v252_v59 = vsel %vm123_vm0, %v222_v54, 0.0  ;;  %v125_v7 = vsel %vm123_vm0, %v518_v11, 0.0 }
  0x27   :  { %v116_v48 = vmul.f32 %v311_v44, %v114_v34  ;;  %v89_v44 = vlaneseq }
  0x29   :  { %v183_v52 = vsel %vm123_vm0, %v116_v48, 0.0  ;;  %v90_v50 = vshrl.u32 %v89_v44, 7 }
  0x2a   :  { %184 = vadd.xlane.f32.xlu2 %v183_v52 }
  0x2b   :  { %v139_v14 = vld.sshfl [vmem:[#allocation1 + $0x10] sm:$0xff pattern:$0x73625140]  ;;  %vm151_vm3 = vcmp.eq.s32.totalorder %v90_v50, 1  ;;  %vm136_vm4 = vcmp.eq.s32.totalorder %v90_v50, 0  ;;  %vm167_vm5 = vcmp.eq.s32.totalorder %v90_v50, 2 }
  0x2c   :  { %154 = vst [vmem:[#allocation1] ss:$4 sm:$0xff] %v105_v8  ;;  %v141_v19 = vsel %vm123_vm0, %v139_v14, 0.0  ;;  %v126_v8 = vadd.f32 %v125_v7, %v124_v6  ;;  %vm180_vm6 = vcmp.eq.s32.totalorder %v90_v50, 3  ;;  %vm193_vm7 = vcmp.eq.s32.totalorder %v90_v50, 5 }
  0x2d   :  { %142 = vadd.xlane.f32.xlu1 %v141_v19  ;;  %vm274_vm8 = vcmp.eq.s32.totalorder %v90_v50, 4 }
  0x33   :  { %v155_v22 = vld.sshfl [vmem:[#allocation1 + $0x18] sm:$0xff pattern:$0x73625140] }
  0x34   :  { %212 = vst [vmem:[#allocation1] ss:$4 sm:$0xff] %v206_v16  ;;  %v157_v33 = vsel %vm123_vm0, %v155_v22, 0.0 }
  0x35   :  { %158 = vadd.xlane.f32.xlu1 %v157_v33 }
  0x3b   :  { %v215_v35 = vld.sshfl [vmem:[#allocation1] sm:$0xff pattern:$0x73625140]  ;;  %v216_v36 = vld.sshfl [vmem:[#allocation1 + $0x8] sm:$0xff pattern:$0x73625140] }
  0x3c   :  { %v217_v37 = vld.sshfl [vmem:[#allocation1 + $0x10] sm:$0xff pattern:$0x73625140]  ;;  %v218_v38 = vld.sshfl [vmem:[#allocation1 + $0x18] sm:$0xff pattern:$0x73625140] }
  0x3d   :  { %223 = vst [vmem:[#allocation1] ss:$4 sm:$0xff] %v208_v31  ;;  %v239_v39 = vsel %vm123_vm0, %v215_v35, 0.0  ;;  %v240_v40 = vsel %vm123_vm0, %v216_v36, 0.0  ;;  %v242_v41 = vsel %vm123_vm0, %v217_v37, 0.0  ;;  %v244_v45 = vsel %vm123_vm0, %v218_v38, 0.0 }
  0x3e   :  { %v241_v43 = vadd.f32 %v240_v40, %v239_v39 }
  0x40   :  { %v243_v47 = vadd.f32 %v242_v41, %v241_v43 }
  0x42   :  { %v245_v51 = vadd.f32 %v244_v45, %v243_v47 }
  0x44   :  { %v247_v55 = vadd.f32 %v246_v49, %v245_v51  ;;  %v224_v57 = vld.sshfl [vmem:[#allocation1] sm:$0xff pattern:$0x73625140]  ;;  %v225_v60 = vld.sshfl [vmem:[#allocation1 + $0x8] sm:$0xff pattern:$0x73625140] }
  0x45   :  { %v254_v62 = vsel %vm123_vm0, %v224_v57, 0.0  ;;  %v226_v63 = vld.sshfl [vmem:[#allocation1 + $0x10] sm:$0xff pattern:$0x73625140]  ;;  %v256_v1 = vsel %vm123_vm0, %v225_v60, 0.0 }
  0x46   :  { %v249_v58 = vadd.f32 %v248_v53, %v247_v55  ;;  %v259_v3 = vsel %vm258_vm1, %v226_v63, 0.0 }
  0x48   :  { %v251_v61 = vadd.f32 %v250_v56, %v249_v58 }
  0x4a   :  { %v253_v0 = vadd.f32 %v252_v59, %v251_v61 }
  0x4c   :  { %v255_v2 = vadd.f32 %v254_v62, %v253_v0 }
  0x4e   :  { %v257_v4 = vadd.f32 %v256_v1, %v255_v2 }
  0x50   :  { %v260_v5 = vadd.f32 %v259_v3, %v257_v4 }
  0x52   :  { %261 = vadd.xlane.f32.xlu0 %v260_v5 }
  0x5a   :  { %127 = vadd.xlane.f32.xlu0 %v126_v8 }
  0x94   :  { %v172_v23 = vpop.xlane.xlu2 %171 }
  0x95   :  { %v173_v30 = vsel %vm123_vm0, %v172_v23, 0.0 }
  0x96   :  { %v174_v34 = vrot.slane %v173_v30, 4 }
  0x98   :  { %v175_v39 = vadd.f32 %v174_v34, %v173_v30 }
  0x9a   :  { %v176_v45 = vrot.slane %v175_v39, 2 }
  0x9c   :  { %v177_v51 = vadd.f32 %v176_v45, %v175_v39 }
  0x9d   :  { %v185_v33 = vpop.xlane.xlu2 %184 }
  0x9e   :  { %v186_v38 = vsel %vm123_vm0, %v185_v33, 0.0  ;;  %v178_v56 = vrot.slane %v177_v51, 1 }
  0x9f   :  { %v187_v43 = vrot.slane %v186_v38, 4 }
  0xa0   :  { %v143_v10 = vpop.xlane.xlu1 %142  ;;  %v179_v62 = vadd.f32 %v178_v56, %v177_v51 }
  0xa1   :  { %v144_v11 = vsel %vm123_vm0, %v143_v10, 0.0  ;;  %v188_v49 = vadd.f32 %v187_v43, %v186_v38 }
  0xa2   :  { %v145_v26 = vrot.slane %v144_v11, 4  ;;  %v181_v2 = vsel %vm180_vm6, %v179_v62, 0.0 }
  0xa3   :  { %v189_v55 = vrot.slane %v188_v49, 2 }
  0xa4   :  { %v146_v29 = vadd.f32 %v145_v26, %v144_v11 }
  0xa5   :  { %v190_v60 = vadd.f32 %v189_v55, %v188_v49 }
  0xa6   :  { %v147_v35 = vrot.slane %v146_v29, 2 }
  0xa7   :  { %v191_v0 = vrot.slane %v190_v60, 1 }
  0xa8   :  { %v159_v25 = vpop.xlane.xlu1 %158  ;;  %v148_v40 = vadd.f32 %v147_v35, %v146_v29 }
  0xa9   :  { %v160_v28 = vsel %vm123_vm0, %v159_v25, 0.0  ;;  %v192_v3 = vadd.f32 %v191_v0, %v190_v60 }
  0xaa   :  { %v161_v32 = vrot.slane %v160_v28, 4  ;;  %v149_v46 = vrot.slane %v148_v40, 1 }
  0xab   :  { %v194_v5 = vsel %vm193_vm7, %v192_v3, 0.0 }
  0xac   :  { %v162_v37 = vadd.f32 %v161_v32, %v160_v28  ;;  %v150_v52 = vadd.f32 %v149_v46, %v148_v40 }
  0xae   :  { %v163_v42 = vrot.slane %v162_v37, 2  ;;  %v152_v57 = vsel %vm151_vm3, %v150_v52, 0.0 }
  0xb0   :  { %v164_v48 = vadd.f32 %v163_v42, %v162_v37 }
  0xb2   :  { %v165_v54 = vrot.slane %v164_v48, 1 }
  0xb4   :  { %v166_v59 = vadd.f32 %v165_v54, %v164_v48 }
  0xb6   :  { %v168_v63 = vsel %vm167_vm5, %v166_v59, 0.0 }
  0xc5   :  { %v262_v13 = vpop.xlane.xlu0 %261 }
  0xc6   :  { %v264_v14 = vmul.f32 %v263_v12, %v262_v13 }
  0xc8   :  { %v266_v15 = vsel %vm265_vm2, %v264_v14, 0.0 }
  0xc9   :  { %v267_v16 = vrot.slane %v266_v15, 4 }
  0xcb   :  { %v268_v17 = vadd.f32 %v267_v16, %v266_v15 }
  0xcd   :  { %v269_v18 = vrot.slane %v268_v17, 2  ;;  %v128_v22 = vpop.xlane.xlu0 %127 }
  0xce   :  { %v129_v24 = vsel %vm123_vm0, %v128_v22, 0.0 }
  0xcf   :  { %v270_v19 = vadd.f32 %v269_v18, %v268_v17  ;;  %v130_v27 = vrot.slane %v129_v24, 4 }
  0xd1   :  { %v271_v20 = vrot.slane %v270_v19, 1  ;;  %v131_v31 = vadd.f32 %v130_v27, %v129_v24 }
  0xd3   :  { %v272_v21 = vadd.f32 %v271_v20, %v270_v19  ;;  %v132_v36 = vrot.slane %v131_v31, 2 }
  0xd5   :  { %277 = vperm.xlu0 %309, %v272_v21   ;;  %v133_v41 = vadd.f32 %v132_v36, %v131_v31 }
  0xd7   :  { %v134_v47 = vrot.slane %v133_v41, 1 }
  0xd9   :  { %v135_v53 = vadd.f32 %v134_v47, %v133_v41 }
  0xdb   :  { %v137_v58 = vsel %vm136_vm4, %v135_v53, 0.0 }
  0xdc   :  { %v153_v61 = vadd.f32 %v152_v57, %v137_v58 }
  0xde   :  { %v169_v1 = vadd.f32 %v168_v63, %v153_v61 }
  0xe0   :  { %v182_v4 = vadd.f32 %v181_v2, %v169_v1 }
  0xe2   :  { %v195_v6 = vadd.f32 %v194_v5, %v182_v4 }
 0x147   :  { %v278_v7 = vpop.permute.xlu0 %277 }
 0x148   :  { %v280_v8 = vsel %vm274_vm8, %v278_v7, 0.0 }
 0x149   :  { %v281_v9 = vadd.f32 %v280_v8, %v195_v6 }
 0x14b   :  { %282 = vst [vmem:[#allocation11] sm:$0xff] %v281_v9 }
 0x14c   :  { %293 = dma.vmem_to_hbm [thread:$0]  %s289_s4, 128, %s291_s17, [#allocation4]  }
 0x14d   :  { %462 = dma.done.wait [#allocation4], 128  }
 0x14e   :  { %463 = vsyncadd [#allocation4], 4294967168 }
 0x14f   :  { %298 = vsyncpa [#allocation3], 1 }
 0x150   :  { %299 = vsyncpa [#allocation6], 1 }
 0x151   :  { %300 = vsyncpa [#allocation9], 1 }
 0x152   :  { %301 = vsyncpa [#allocation4], 1 }

</bundles_post_ra>
